<compile_context>
chip_gen: v5e
topology: v5e:2x2
jax: 0.10.0
libtpu: 0.0.40
codegen_flags: <defaults>
</compile_context>

<pallas_src>
from math import sqrt

import jax
import jax.numpy as jnp
import numpy as np
from jax import lax
from jax.experimental import pallas as pl
from jax.experimental.pallas import tpu as pltpu


def _kernel_full_width(x_ref, w_ref, b_ref, o_ref):
    # x_ref: (TM, H); w_ref: (H, H) PyTorch (out, in); b_ref: (1, H); o_ref: (TM, H)
    x = x_ref[...]
    y = lax.dot_general(
        x,
        w_ref[...],
        dimension_numbers=(((1,), (1,)), ((), ())),  # x @ W^T on the MXU
        preferred_element_type=jnp.float32,
        precision=lax.Precision.HIGHEST,
    )
    out = x.astype(jnp.float32) + y + b_ref[...].astype(jnp.float32)
    o_ref[...] = out.astype(o_ref.dtype)


def _kernel_col_tiled(x_ref, xres_ref, w_ref, b_ref, o_ref):
    # x_ref:    (TM, H)  full contraction dim (matmul operand)
    # xres_ref: (TM, TN) residual columns for this output tile
    # w_ref:    (TN, H)  weight tile, PyTorch (out, in) layout
    # b_ref:    (1, TN)  bias tile
    # o_ref:    (TM, TN) output tile
    y = lax.dot_general(
        x_ref[...],
        w_ref[...],
        dimension_numbers=(((1,), (1,)), ((), ())),
        preferred_element_type=jnp.float32,
        precision=lax.Precision.HIGHEST,
    )
    out = xres_ref[...].astype(jnp.float32) + y + b_ref[...].astype(jnp.float32)
    o_ref[...] = out.astype(o_ref.dtype)


def _pick_col_tile(H, tn_max):
    """Largest multiple of 128 that divides H and is <= tn_max (falls back to H)."""
    tn = (min(tn_max, H) // 128) * 128
    while tn > 0 and H % tn != 0:
        tn -= 128
    return tn if tn > 0 else H


def residual_add_linear(x2d, w_out_in, b, *, tm=256, tn=512):
    """x2d: [M, H]; w_out_in: [H, H] PyTorch (out, in); b: [H].

    Returns x + x @ w_out_in.T + b, fused in a single Pallas kernel.
    """
    M, H = x2d.shape
    assert w_out_in.shape == (H, H) and b.shape == (H,)
    assert H % 128 == 0, "hidden dim must be a multiple of the 128-lane width"

    # --- tile sizing -------------------------------------------------------
    # Sublane minimum: 8 rows for 4-byte dtypes, 16 for 2-byte (bf16).
    min_sub = 16 if x2d.dtype.itemsize == 2 else 8
    tm = max(min_sub, min(tm, pl.cdiv(M, min_sub) * min_sub))
    m_pad = pl.cdiv(M, tm) * tm
    x_in = x2d if m_pad == M else jnp.pad(x2d, ((0, m_pad - M), (0, 0)))
    m_tiles = m_pad // tm

    tn = _pick_col_tile(H, tn)
    n_col_tiles = H // tn

    b2d = b.reshape(1, H)

    cost = pl.CostEstimate(
        flops=2 * m_pad * H * H,
        transcendentals=0,
        bytes_accessed=(
            (n_col_tiles + 1) * m_pad * H * x2d.dtype.itemsize
            + w_out_in.nbytes
            + b.nbytes
        ),
    )
    cparams = pltpu.CompilerParams(
        dimension_semantics=("parallel",) * (1 if n_col_tiles == 1 else 2),
        vmem_limit_bytes=32 * 1024 * 1024,  # fits v5e/v6e/v7x budgets
    )

    if n_col_tiles == 1:
        # Whole weight fits as one column tile: 1-D grid over row tiles; the
        # weight/bias block indices are constant, so they are DMA'd once.
        out = pl.pallas_call(
            _kernel_full_width,
            out_shape=jax.ShapeDtypeStruct((m_pad, H), x2d.dtype),
            grid_spec=pltpu.PrefetchScalarGridSpec(
                num_scalar_prefetch=0,
                grid=(m_tiles,),
                in_specs=[
                    pl.BlockSpec((tm, H), lambda i: (i, 0)),  # x row tile
                    pl.BlockSpec((H, H), lambda i: (0, 0)),   # full weight
                    pl.BlockSpec((1, H), lambda i: (0, 0)),   # bias
                ],
                out_specs=pl.BlockSpec((tm, H), lambda i: (i, 0)),
            ),
            compiler_params=cparams,
            cost_estimate=cost,
        )(x_in, w_out_in, b2d)
    else:
        # Column tile outer, row tile inner: the (tn, H) weight tile keeps a
        # constant block index along the inner axis, so it is re-DMA'd only
        # when the column tile changes (total weight traffic = H*H elements).
        out = pl.pallas_call(
            _kernel_col_tiled,
            out_shape=jax.ShapeDtypeStruct((m_pad, H), x2d.dtype),
            grid_spec=pltpu.PrefetchScalarGridSpec(
                num_scalar_prefetch=0,
                grid=(n_col_tiles, m_tiles),
                in_specs=[
                    pl.BlockSpec((tm, H), lambda j, i: (i, 0)),   # x (matmul)
                    pl.BlockSpec((tm, tn), lambda j, i: (i, j)),  # x (residual cols)
                    pl.BlockSpec((tn, H), lambda j, i: (j, 0)),   # weight (out, in)
                    pl.BlockSpec((1, tn), lambda j, i: (0, j)),   # bias tile
                ],
                out_specs=pl.BlockSpec((tm, tn), lambda j, i: (i, j)),
            ),
            compiler_params=cparams,
            cost_estimate=cost,
        )(x_in, x_in, w_out_in, b2d)

    return out[:M] if m_pad != M else out


if __name__ == "__main__":
    # Small shapes consistent with the forward: batch=2, seq=8, hidden=128.
    batch, seq, hidden = 2, 8, 128
    key = jax.random.PRNGKey(0)
    kx, kw, kb = jax.random.split(key, 3)

    x = jax.random.normal(kx, (batch, seq, hidden), dtype=jnp.float32)

    # Deterministic nn.Linear-style init: U(-1/sqrt(H), 1/sqrt(H)),
    # weight stored in PyTorch (out, in) layout and passed as-is (no .T copy).
    bound = 1.0 / sqrt(hidden)
    w_out_in = jax.random.uniform(
        kw, (hidden, hidden), minval=-bound, maxval=bound, dtype=jnp.float32
    )
    b = jax.random.uniform(
        kb, (hidden,), minval=-bound, maxval=bound, dtype=jnp.float32
    )

    # Glue: flatten batch/seq (ResidualAdd's `block` acts on the last dim).
    x2d = x.reshape(batch * seq, hidden)
    out2d = residual_add_linear(x2d, w_out_in, b)
    out = out2d.reshape(batch, seq, hidden)
    jax.block_until_ready(out)

    # Correctness check against a float64 numpy ground truth of x + Linear(x).
    xh = np.asarray(x, dtype=np.float64)
    wh = np.asarray(w_out_in, dtype=np.float64)
    bh = np.asarray(b, dtype=np.float64)
    ref = xh + (xh @ wh.T + bh)
    np.testing.assert_allclose(
        np.asarray(out, dtype=np.float64), ref, atol=1e-4, rtol=1e-4
    )

    print("KERNEL_OK")
</pallas_src>

<mosaic_0001>
module attributes {stable_mosaic.version = 11 : i64} {
  func.func @_kernel_full_width(%arg0: i32, %arg1: memref<16x128xf32, #tpu.memory_space<vmem>>, %arg2: memref<128x128xf32, #tpu.memory_space<vmem>>, %arg3: memref<1x128xf32, #tpu.memory_space<vmem>>, %arg4: memref<16x128xf32, #tpu.memory_space<vmem>>) attributes {dimension_semantics = [#tpu.dimension_semantics<parallel>], iteration_bounds = array<i64: 1>, scalar_prefetch = 0 : i64, scratch_operands = 0 : i64, tpu.core_type = #tpu.core_type<tc>, window_params = [{transform_indices = @transform_0, window_bounds = array<i64: 16, 128>}, {pipeline_mode = #tpu.pipeline_mode<synchronous>, transform_indices = @transform_1, window_bounds = array<i64: 128, 128>}, {pipeline_mode = #tpu.pipeline_mode<synchronous>, transform_indices = @transform_2, window_bounds = array<i64: 1, 128>}, {transform_indices = @transform_3, window_bounds = array<i64: 16, 128>}]} {
    %c0 = arith.constant 0 : index
    %c0_0 = arith.constant 0 : index
    %0 = vector.load %arg1[%c0, %c0_0] : memref<16x128xf32, #tpu.memory_space<vmem>>, vector<16x128xf32>
    %c0_1 = arith.constant 0 : index
    %c0_2 = arith.constant 0 : index
    %1 = vector.load %arg2[%c0_1, %c0_2] : memref<128x128xf32, #tpu.memory_space<vmem>>, vector<128x128xf32>
    %cst = arith.constant dense<0.000000e+00> : vector<16x128xf32>
    %2 = tpu.matmul %0, %1, %cst {dimension_numbers = #tpu.dot_dimension_numbers<[1], [1], [0], [0], [0, 0, 1, 0], [], []>, precision = #tpu.contract_precision<fp32>} : vector<16x128xf32>, vector<128x128xf32>, vector<16x128xf32> -> vector<16x128xf32>
    %3 = arith.addf %0, %2 : vector<16x128xf32>
    %c0_3 = arith.constant 0 : index
    %c0_4 = arith.constant 0 : index
    %4 = vector.load %arg3[%c0_3, %c0_4] : memref<1x128xf32, #tpu.memory_space<vmem>>, vector<1x128xf32>
    %5 = vector.broadcast %4 : vector<1x128xf32> to vector<16x128xf32>
    %6 = arith.addf %3, %5 : vector<16x128xf32>
    %c0_5 = arith.constant 0 : index
    %c0_6 = arith.constant 0 : index
    %7 = vector.load %arg4[%c0_5, %c0_6] : memref<16x128xf32, #tpu.memory_space<vmem>>, vector<16x128xf32>
    tpu.vector_store %arg4[%c0_5, %c0_6], %6 {strides = array<i32>} : memref<16x128xf32, #tpu.memory_space<vmem>>, vector<16x128xf32>,
    return
  }
  func.func @transform_0(%arg0: i32) -> (i32, i32) {
    %c0_i32 = arith.constant 0 : i32
    %c0_i32_0 = arith.constant 0 : i32
    return %arg0, %c0_i32 : i32, i32
  }
  func.func @transform_1(%arg0: i32) -> (i32, i32) {
    %c0_i32 = arith.constant 0 : i32
    %c0_i32_0 = arith.constant 0 : i32
    %c0_i32_1 = arith.constant 0 : i32
    return %c0_i32, %c0_i32_0 : i32, i32
  }
  func.func @transform_2(%arg0: i32) -> (i32, i32) {
    %c0_i32 = arith.constant 0 : i32
    %c0_i32_0 = arith.constant 0 : i32
    %c0_i32_1 = arith.constant 0 : i32
    return %c0_i32, %c0_i32_0 : i32, i32
  }
  func.func @transform_3(%arg0: i32) -> (i32, i32) {
    %c0_i32 = arith.constant 0 : i32
    %c0_i32_0 = arith.constant 0 : i32
    return %arg0, %c0_i32 : i32, i32
  }
}

</mosaic_0001>

<bundles_post_ra>
// kernel: tpu_custom_call.1
= control target key start
LH: loop header
LB: loop body
LE: loop exit
PB: predicated region body
PF: predicated region fallthrough
CT: control target
= control target key end

     0   :  { %8 = vsyncpa [#allocation3], 0  ;;  %s837_s0 = inlined_call_operand.hbm [shape: f32[16,128], index: 0, kind: input, shape index: {}]   ;;  %s838_s1 = inlined_call_operand.hbm [shape: f32[128,128], index: 1, kind: input, shape index: {}]   ;;  %s839_s2 = inlined_call_operand.vmem [shape: f32[1,128], index: 2, kind: input, shape index: {}]   ;;  %s840_s3 = inlined_call_operand.hbm [shape: f32[16,128], index: 3, kind: output, shape index: {}]  }
   0x1   :  { %9 = vsyncpa [#allocation6], 0 }
   0x2   :  { %10 = vsyncpa [#allocation4], 0  ;;  %s15_s14 = sshll.u32 %s837_s0, 4  ;;  %s583_s15 = smov [#allocation2]   ;;  %s16_s14 = int_to_ptr.hbm [resolvable:$true] %s15_s14 }
   0x3   :  { %s17_s16 = sshll.u32 %s583_s15, 4  ;;  %s28_s19 = sshll.u32 %s838_s1, 4  ;;  %s18_s16 = int_to_ptr.vmem [resolvable:$true] %s17_s16  ;;  %s29_s19 = int_to_ptr.hbm [resolvable:$true] %s28_s19 }
   0x4   :  { %s584_s20 = smov 128   ;;  %s585_s21 = smov 8  }
   0x5   :  { %23 = dma.hbm_to_vmem [thread:$0]  %s16_s14, 256, %s18_s16, [#allocation3], %s584_s20, %s584_s20, %s585_s21  }
   0x6   :  { %s586_s22 = smov [#allocation5]  }
   0x7   :  { %s30_s23 = sshll.u32 %s586_s22, 4  ;;  %s31_s23 = int_to_ptr.vmem [resolvable:$true] %s30_s23 }
   0x8   :  { %36 = dma.hbm_to_vmem [thread:$0]  %s29_s19, 2048, %s31_s23, [#allocation6], %s584_s20, %s584_s20, %s585_s21  }
   0x9   :  { %577 = dma.done.wait [#allocation3], 256  }
   0xa   :  { %578 = vsyncadd [#allocation3], 4294967040 }
   0xb   :  { %579 = dma.done.wait [#allocation6], 2048  }
   0xc   :  { %580 = vsyncadd [#allocation6], 4294965248  ;;  %v64_v0 = vld [vmem:[#allocation5 + $0x78] sm:$0xff]  ;;  %v63_v1 = vld [vmem:[#allocation5 + $0x70] sm:$0xff]  ;;  %s587_s24 = smov [#allocation7]   ;;  %s453_s28 = sshll.u32 %s840_s3, 4  ;;  %s454_s28 = int_to_ptr.hbm [resolvable:$true] %s453_s28 }
   0xd   :  { %v62_v2 = vld [vmem:[#allocation5 + $0x68] sm:$0xff]  ;;  %v620_v3 = vand.u32 4294901760, %v64_v0  ;;  %v622_v4 = vand.u32 4294901760, %v63_v1  ;;  %v61_v6 = vld [vmem:[#allocation5 + $0x60] sm:$0xff]  ;;  %v60_v11 = vld [vmem:[#allocation5 + $0x58] sm:$0xff]  ;;  %s451_s25 = sshll.u32 %s587_s24, 4  ;;  %s452_s25 = int_to_ptr.vmem [resolvable:$true] %s451_s25 }
   0xe   :  { %v624_v5 = vand.u32 4294901760, %v62_v2  ;;  %v631_v10 = vand.u32 4294901760, %v61_v6  ;;  %v637_v14 = vand.u32 4294901760, %v60_v11  ;;  %v59_v19 = vld [vmem:[#allocation5 + $0x50] sm:$0xff]  ;;  %v58_v26 = vld [vmem:[#allocation5 + $0x48] sm:$0xff]  ;;  %v57_v32 = vld [vmem:[#allocation5 + $0x40] sm:$0xff] }
   0xf   :  { %66 = vmatpush.xpose.msra.mxu0 %v620_v3  ;;  %v115_v7 = vsub.f32 %v64_v0, %v620_v3  ;;  %279 = vmatpush.xpose.msra.mxu3 %v620_v3  ;;  %v121_v8 = vsub.f32 %v63_v1, %v622_v4  ;;  %v646_v21 = vand.u32 4294901760, %v59_v19  ;;  %v654_v27 = vand.u32 4294901760, %v58_v26  ;;  %v56_v38 = vld [vmem:[#allocation5 + $0x38] sm:$0xff]  ;;  %v55_v44 = vld [vmem:[#allocation5 + $0x30] sm:$0xff]  ;;  %v54_v50 = vld [vmem:[#allocation5 + $0x28] sm:$0xff] }
  0x10   :  { %v127_v9 = vsub.f32 %v62_v2, %v624_v5  ;;  %v133_v17 = vsub.f32 %v61_v6, %v631_v10  ;;  %v139_v24 = vsub.f32 %v60_v11, %v637_v14  ;;  %v662_v33 = vand.u32 4294901760, %v57_v32  ;;  %v53_v56 = vld [vmem:[#allocation5 + $0x20] sm:$0xff]  ;;  %v52_v62 = vld [vmem:[#allocation5 + $0x18] sm:$0xff] }
  0x11   :  { %221 = vmatpush.xpose.msra.mxu2 %v115_v7  ;;  %v633_v12 = vand.u32 4294901760, %v115_v7  ;;  %v635_v13 = vand.u32 4294901760, %v121_v8  ;;  %v145_v30 = vsub.f32 %v59_v19, %v646_v21  ;;  %v151_v36 = vsub.f32 %v58_v26, %v654_v27  ;;  %v49_v26 = vld [vmem:[#allocation5] sm:$0xff] }
  0x12   :  { %v644_v18 = vand.u32 4294901760, %v127_v9  ;;  %v651_v25 = vand.u32 4294901760, %v133_v17  ;;  %v659_v31 = vand.u32 4294901760, %v139_v24  ;;  %v670_v39 = vand.u32 4294901760, %v56_v38 }
  0x13   :  { %68 = vmatpush.xpose.msra.mxu0 %v622_v4  ;;  %v117_v15 = vsub.f32 %v115_v7, %v633_v12  ;;  %281 = vmatpush.xpose.msra.mxu3 %v622_v4  ;;  %v123_v16 = vsub.f32 %v121_v8, %v635_v13  ;;  %v667_v37 = vand.u32 4294901760, %v145_v30  ;;  %v157_v42 = vsub.f32 %v57_v32, %v662_v33  ;;  %v51_v7 = vld [vmem:[#allocation5 + $0x10] sm:$0xff] }
  0x14   :  { %v129_v23 = vsub.f32 %v127_v9, %v644_v18  ;;  %v135_v29 = vsub.f32 %v133_v17, %v651_v25  ;;  %v141_v35 = vsub.f32 %v139_v24, %v659_v31  ;;  %v675_v43 = vand.u32 4294901760, %v151_v36 }
  0x15   :  { %224 = vmatpush.xpose.msra.mxu2 %v121_v8  ;;  %v118_v20 = vand.u32 4294901760, %v117_v15  ;;  %v124_v22 = vand.u32 4294901760, %v123_v16  ;;  %v147_v41 = vsub.f32 %v145_v30, %v667_v37  ;;  %v163_v45 = vsub.f32 %v56_v38, %v670_v39 }
  0x16   :  { %v130_v28 = vand.u32 4294901760, %v129_v23  ;;  %v136_v34 = vand.u32 4294901760, %v135_v29  ;;  %v142_v40 = vand.u32 4294901760, %v141_v35  ;;  %v153_v47 = vsub.f32 %v151_v36, %v675_v43 }
  0x17   :  { %70 = vmatpush.xpose.msra.mxu0 %v624_v5  ;;  %119 = vmatpush.xpose.msra.mxu1 %v118_v20  ;;  %v148_v46 = vand.u32 4294901760, %v147_v41  ;;  %v681_v48 = vand.u32 4294901760, %v55_v44  ;;  %v683_v49 = vand.u32 4294901760, %v157_v42  ;;  %v686_v51 = vand.u32 4294901760, %v54_v50 }
  0x18   :  { %283 = vmatpush.xpose.msra.mxu3 %v624_v5  ;;  %v154_v52 = vand.u32 4294901760, %v153_v47  ;;  %v691_v55 = vand.u32 4294901760, %v163_v45  ;;  %v694_v57 = vand.u32 4294901760, %v53_v56  ;;  %v705_v2 = vand.u32 4294901760, %v52_v62 }
  0x19   :  { %227 = vmatpush.xpose.msra.mxu2 %v127_v9  ;;  %v159_v53 = vsub.f32 %v157_v42, %v683_v49  ;;  %v169_v54 = vsub.f32 %v55_v44, %v681_v48  ;;  %v175_v60 = vsub.f32 %v54_v50, %v686_v51  ;;  %v715_v16 = vand.u32 4294901760, %v51_v7  ;;  %v752_v50 = vld [vmem:[#allocation2] sm:$0xff] }
  0x1a   :  { %v165_v59 = vsub.f32 %v163_v45, %v691_v55  ;;  %v181_v63 = vsub.f32 %v53_v56, %v694_v57  ;;  %v187_v15 = vsub.f32 %v52_v62, %v705_v2  ;;  %v729_v32 = vand.u32 4294901760, %v49_v26 }
  0x1b   :  { %72 = vmatpush.xpose.msra.mxu0 %v631_v10  ;;  %125 = vmatpush.xpose.msra.mxu1 %v124_v22  ;;  %v160_v58 = vand.u32 4294901760, %v159_v53  ;;  %v699_v61 = vand.u32 4294901760, %v169_v54  ;;  %v707_v6 = vand.u32 4294901760, %v175_v60  ;;  %v193_v22 = vsub.f32 %v51_v7, %v715_v16 }
  0x1c   :  { %285 = vmatpush.xpose.msra.mxu3 %v631_v10  ;;  %v166_v0 = vand.u32 4294901760, %v165_v59  ;;  %v710_v8 = vand.u32 4294901760, %v181_v63  ;;  %v205_v38 = vsub.f32 %v49_v26, %v729_v32 }
  0x1d   :  { %230 = vmatpush.xpose.msra.mxu2 %v133_v17  ;;  %v171_v1 = vsub.f32 %v169_v54, %v699_v61  ;;  %v177_v11 = vsub.f32 %v175_v60, %v707_v6  ;;  %v50_v17 = vld [vmem:[#allocation5 + $0x8] sm:$0xff] }
  0x1e   :  { %v183_v19 = vsub.f32 %v181_v63, %v710_v8  ;;  %v721_v23 = vand.u32 4294901760, %v50_v17  ;;  %v742_v44 = vand.u32 4294901760, %v205_v38 }
  0x1f   :  { %74 = vmatpush.xpose.msra.mxu0 %v637_v14  ;;  %131 = vmatpush.xpose.msra.mxu1 %v130_v28  ;;  %v172_v9 = vand.u32 4294901760, %v171_v1  ;;  %v178_v20 = vand.u32 4294901760, %v177_v11  ;;  %v504_v1 = vld [vmem:[%s839_s2] ss:$0 sm:$0xff] }
  0x20   :  { %287 = vmatpush.xpose.msra.mxu3 %v637_v14  ;;  %v184_v28 = vand.u32 4294901760, %v183_v19 }
  0x21   :  { %233 = vmatpush.xpose.msra.mxu2 %v139_v24  ;;  %v723_v24 = vand.u32 4294901760, %v187_v15 }
  0x23   :  { %76 = vmatpush.xpose.msra.mxu0 %v646_v21  ;;  %137 = vmatpush.xpose.msra.mxu1 %v136_v34  ;;  %v189_v29 = vsub.f32 %v187_v15, %v723_v24  ;;  %v731_v34 = vand.u32 4294901760, %v193_v22 }
  0x24   :  { %289 = vmatpush.xpose.msra.mxu3 %v646_v21 }
  0x25   :  { %236 = vmatpush.xpose.msra.mxu2 %v145_v30  ;;  %v199_v30 = vsub.f32 %v50_v17, %v721_v23  ;;  %v190_v35 = vand.u32 4294901760, %v189_v29 }
  0x27   :  { %78 = vmatpush.xpose.msra.mxu0 %v654_v27  ;;  %143 = vmatpush.xpose.msra.mxu1 %v142_v40  ;;  %v737_v40 = vand.u32 4294901760, %v199_v30 }
  0x28   :  { %291 = vmatpush.xpose.msra.mxu3 %v654_v27 }
  0x29   :  { %239 = vmatpush.xpose.msra.mxu2 %v151_v36  ;;  %v195_v36 = vsub.f32 %v193_v22, %v731_v34 }
  0x2b   :  { %80 = vmatpush.xpose.msra.mxu0 %v662_v33  ;;  %149 = vmatpush.xpose.msra.mxu1 %v148_v46  ;;  %v196_v41 = vand.u32 4294901760, %v195_v36  ;;  %v207_v46 = vsub.f32 %v205_v38, %v742_v44 }
  0x2c   :  { %293 = vmatpush.xpose.msra.mxu3 %v662_v33 }
  0x2d   :  { %242 = vmatpush.xpose.msra.mxu2 %v157_v42  ;;  %v201_v42 = vsub.f32 %v199_v30, %v737_v40  ;;  %v208_v47 = vand.u32 4294901760, %v207_v46 }
  0x2f   :  { %82 = vmatpush.xpose.msra.mxu0 %v670_v39  ;;  %155 = vmatpush.xpose.msra.mxu1 %v154_v52  ;;  %v756_v52 = vand.u32 4294901760, %v752_v50 }
  0x30   :  { %295 = vmatpush.xpose.msra.mxu3 %v670_v39 }
  0x31   :  { %245 = vmatpush.xpose.msra.mxu2 %v163_v45  ;;  %v202_v45 = vand.u32 4294901760, %v201_v42  ;;  %v98_v53 = vsub.f32 %v752_v50, %v756_v52 }
  0x33   :  { %84 = vmatpush.xpose.msra.mxu0 %v681_v48  ;;  %161 = vmatpush.xpose.msra.mxu1 %v160_v58 }
  0x34   :  { %297 = vmatpush.xpose.msra.mxu3 %v681_v48 }
  0x35   :  { %248 = vmatpush.xpose.msra.mxu2 %v169_v54 }
  0x37   :  { %86 = vmatpush.xpose.msra.mxu0 %v686_v51  ;;  %167 = vmatpush.xpose.msra.mxu1 %v166_v0 }
  0x38   :  { %299 = vmatpush.xpose.msra.mxu3 %v686_v51 }
  0x39   :  { %251 = vmatpush.xpose.msra.mxu2 %v175_v60 }
  0x3b   :  { %88 = vmatpush.xpose.msra.mxu0 %v694_v57  ;;  %173 = vmatpush.xpose.msra.mxu1 %v172_v9 }
  0x3c   :  { %301 = vmatpush.xpose.msra.mxu3 %v694_v57 }
  0x3d   :  { %254 = vmatpush.xpose.msra.mxu2 %v181_v63 }
  0x3f   :  { %90 = vmatpush.xpose.msra.mxu0 %v705_v2  ;;  %179 = vmatpush.xpose.msra.mxu1 %v178_v20 }
  0x40   :  { %303 = vmatpush.xpose.msra.mxu3 %v705_v2 }
  0x41   :  { %257 = vmatpush.xpose.msra.mxu2 %v187_v15 }
  0x43   :  { %92 = vmatpush.xpose.msra.mxu0 %v715_v16  ;;  %185 = vmatpush.xpose.msra.mxu1 %v184_v28 }
  0x44   :  { %305 = vmatpush.xpose.msra.mxu3 %v715_v16 }
  0x45   :  { %260 = vmatpush.xpose.msra.mxu2 %v193_v22 }
  0x47   :  { %94 = vmatpush.xpose.msra.mxu0 %v721_v23  ;;  %191 = vmatpush.xpose.msra.mxu1 %v190_v35 }
  0x48   :  { %307 = vmatpush.xpose.msra.mxu3 %v721_v23 }
  0x49   :  { %263 = vmatpush.xpose.msra.mxu2 %v199_v30 }
  0x4b   :  { %96 = vmatpush.xpose.msra.mxu0 %v729_v32  ;;  %197 = vmatpush.xpose.msra.mxu1 %v196_v41 }
  0x4c   :  { %309 = vmatpush.xpose.msra.mxu3 %v729_v32 }
  0x4d   :  { %266 = vmatpush.xpose.msra.mxu2 %v205_v38 }
  0x4f   :  { %326 = vmatpush.xpose.msrb.mxu0 %v633_v12  ;;  %203 = vmatpush.xpose.msra.mxu1 %v202_v45 }
  0x50   :  { %483 = vmatpush.xpose.msrb.mxu3 %v620_v3  ;;  %269 = vmatmul.f32.vlgmr.msra.gmra.mxu2 %v98_v53 }
  0x51   :  { %467 = vmatpush.xpose.msrb.mxu2 %v633_v12  ;;  %v99_v12 = vand.u32 4294901760, %v98_v53 }
  0x53   :  { %330 = vmatpush.xpose.msrb.mxu0 %v635_v13  ;;  %209 = vmatpush.xpose.msra.mxu1 %v208_v47  ;;  %v100_v54 = vsub.f32 %v98_v53, %v99_v12 }
  0x54   :  { %484 = vmatpush.xpose.msrb.mxu3 %v622_v4 }
  0x55   :  { %468 = vmatpush.xpose.msrb.mxu2 %v635_v13  ;;  %313 = vmatmul.f32.vlgmr.msra.gmra.mxu3 %v99_v12  ;;  %v768_v13 = vld [vmem:[#allocation2 + $0x8] sm:$0xff]  ;;  %v101_v56 = vand.u32 4294901760, %v100_v54 }
  0x56   :  { %211 = vmatmul.f32.vlgmr.msra.gmra.mxu1 %v756_v52 }
  0x57   :  { %334 = vmatpush.xpose.msrb.mxu0 %v644_v18  ;;  %397 = vmatpush.xpose.msrb.mxu1 %v620_v3  ;;  %v105_v3 = vand.u32 4294901760, %v768_v13 }
  0x58   :  { %485 = vmatpush.xpose.msrb.mxu3 %v624_v5  ;;  %102 = vmatmul.f32.vlgmr.msra.gmra.mxu0 %v101_v56 }
  0x59   :  { %469 = vmatpush.xpose.msrb.mxu2 %v644_v18  ;;  %v106_v18 = vsub.f32 %v768_v13, %v105_v3 }
  0x5b   :  { %338 = vmatpush.xpose.msrb.mxu0 %v651_v25  ;;  %399 = vmatpush.xpose.msrb.mxu1 %v622_v4  ;;  %v107_v58 = vand.u32 4294901760, %v106_v18 }
  0x5c   :  { %486 = vmatpush.xpose.msrb.mxu3 %v631_v10  ;;  %274 = vmatmul.f32.gmra.mxu2 %v106_v18 }
  0x5d   :  { %470 = vmatpush.xpose.msrb.mxu2 %v651_v25  ;;  %v108_v4 = vsub.f32 %v106_v18, %v107_v58  ;;  %319 = vmatmul.f32.gmra.mxu3 %v107_v58 }
  0x5e   :  { %215 = vmatmul.f32.gmra.mxu1 %v105_v3 }
  0x5f   :  { %342 = vmatpush.xpose.msrb.mxu0 %v659_v31  ;;  %401 = vmatpush.xpose.msrb.mxu1 %v624_v5  ;;  %v109_v25 = vand.u32 4294901760, %v108_v4 }
  0x60   :  { %487 = vmatpush.xpose.msrb.mxu3 %v637_v14 }
  0x61   :  { %471 = vmatpush.xpose.msrb.mxu2 %v659_v31  ;;  %110 = vmatmul.f32.gmra.mxu0 %v109_v25 }
  0x63   :  { %346 = vmatpush.xpose.msrb.mxu0 %v667_v37  ;;  %403 = vmatpush.xpose.msrb.mxu1 %v631_v10 }
  0x64   :  { %488 = vmatpush.xpose.msrb.mxu3 %v646_v21 }
  0x65   :  { %472 = vmatpush.xpose.msrb.mxu2 %v667_v37 }
  0x67   :  { %350 = vmatpush.xpose.msrb.mxu0 %v675_v43  ;;  %405 = vmatpush.xpose.msrb.mxu1 %v637_v14 }
  0x68   :  { %489 = vmatpush.xpose.msrb.mxu3 %v654_v27 }
  0x69   :  { %473 = vmatpush.xpose.msrb.mxu2 %v675_v43 }
  0x6b   :  { %354 = vmatpush.xpose.msrb.mxu0 %v683_v49  ;;  %407 = vmatpush.xpose.msrb.mxu1 %v646_v21 }
  0x6c   :  { %490 = vmatpush.xpose.msrb.mxu3 %v662_v33 }
  0x6d   :  { %474 = vmatpush.xpose.msrb.mxu2 %v683_v49 }
  0x6f   :  { %358 = vmatpush.xpose.msrb.mxu0 %v691_v55  ;;  %409 = vmatpush.xpose.msrb.mxu1 %v654_v27 }
  0x70   :  { %491 = vmatpush.xpose.msrb.mxu3 %v670_v39 }
  0x71   :  { %475 = vmatpush.xpose.msrb.mxu2 %v691_v55 }
  0x73   :  { %362 = vmatpush.xpose.msrb.mxu0 %v699_v61  ;;  %411 = vmatpush.xpose.msrb.mxu1 %v662_v33 }
  0x74   :  { %492 = vmatpush.xpose.msrb.mxu3 %v681_v48 }
  0x75   :  { %476 = vmatpush.xpose.msrb.mxu2 %v699_v61 }
  0x77   :  { %366 = vmatpush.xpose.msrb.mxu0 %v707_v6  ;;  %413 = vmatpush.xpose.msrb.mxu1 %v670_v39 }
  0x78   :  { %493 = vmatpush.xpose.msrb.mxu3 %v686_v51 }
  0x79   :  { %477 = vmatpush.xpose.msrb.mxu2 %v707_v6 }
  0x7b   :  { %370 = vmatpush.xpose.msrb.mxu0 %v710_v8  ;;  %415 = vmatpush.xpose.msrb.mxu1 %v681_v48 }
  0x7c   :  { %494 = vmatpush.xpose.msrb.mxu3 %v694_v57 }
  0x7d   :  { %478 = vmatpush.xpose.msrb.mxu2 %v710_v8 }
  0x7f   :  { %374 = vmatpush.xpose.msrb.mxu0 %v723_v24  ;;  %417 = vmatpush.xpose.msrb.mxu1 %v686_v51 }
  0x80   :  { %495 = vmatpush.xpose.msrb.mxu3 %v705_v2 }
  0x81   :  { %479 = vmatpush.xpose.msrb.mxu2 %v723_v24 }
  0x83   :  { %378 = vmatpush.xpose.msrb.mxu0 %v731_v34  ;;  %419 = vmatpush.xpose.msrb.mxu1 %v694_v57 }
  0x84   :  { %496 = vmatpush.xpose.msrb.mxu3 %v715_v16 }
  0x85   :  { %480 = vmatpush.xpose.msrb.mxu2 %v731_v34 }
  0x87   :  { %382 = vmatpush.xpose.msrb.mxu0 %v737_v40  ;;  %421 = vmatpush.xpose.msrb.mxu1 %v705_v2 }
  0x88   :  { %497 = vmatpush.xpose.msrb.mxu3 %v721_v23 }
  0x89   :  { %481 = vmatpush.xpose.msrb.mxu2 %v737_v40 }
  0x8b   :  { %386 = vmatpush.xpose.msrb.mxu0 %v742_v44  ;;  %423 = vmatpush.xpose.msrb.mxu1 %v715_v16 }
  0x8c   :  { %498 = vmatpush.xpose.msrb.mxu3 %v729_v32 }
  0x8d   :  { %482 = vmatpush.xpose.msrb.mxu2 %v742_v44 }
  0x8e   :  { %388 = vmatmul.f32.vlgmr.msrb.gmra.mxu0 %v756_v52 }
  0x8f   :  { %425 = vmatpush.xpose.msrb.mxu1 %v721_v23  ;;  %433 = vmatmul.f32.vlgmr.msrb.gmra.mxu3 %v105_v3 }
  0x90   :  { %392 = vmatmul.f32.vlgmr.msrb.gmra.mxu2 %v105_v3 }
  0x93   :  { %427 = vmatpush.xpose.msrb.mxu1 %v729_v32 }
  0x96   :  { %429 = vmatmul.f32.vlgmr.msrb.gmra.mxu1 %v756_v52 }
  0xd3   :  { %v212_v10 = vpop.f32.mrf.mxu1  ;;  %v270_v21 = vpop.f32.mrf.mxu2 }
  0xd5   :  { %v103_v5 = vpop.f32.mrf.mxu0 }
  0xd6   :  { %v213_v33 = vadd.f32 %v212_v10, %v103_v5 }
  0xd8   :  { %v314_v14 = vpop.f32.mrf.mxu3  ;;  %v271_v48 = vadd.f32 %v270_v21, %v213_v33 }
  0xda   :  { %v315_v55 = vadd.f32 %v314_v14, %v271_v48 }
  0xdb   :  { %v216_v31 = vpop.f32.mrf.mxu1 }
  0xde   :  { %v111_v27 = vpop.f32.mrf.mxu0 }
  0xdf   :  { %v275_v39 = vpop.f32.mrf.mxu2  ;;  %v217_v43 = vadd.f32 %v216_v31, %v111_v27 }
  0xe0   :  { %v320_v37 = vpop.f32.mrf.mxu3 }
  0xe1   :  { %v276_v49 = vadd.f32 %v275_v39, %v217_v43 }
  0xe3   :  { %v321_v59 = vadd.f32 %v320_v37, %v276_v49 }
 0x10b   :  { %v389_v51 = vpop.f32.mrf.mxu0 }
 0x10c   :  { %v390_v57 = vadd.f32 %v389_v51, %v315_v55 }
 0x112   :  { %v434_v60 = vpop.f32.mrf.mxu3 }
 0x113   :  { %v393_v61 = vpop.f32.mrf.mxu2  ;;  %v430_v62 = vpop.f32.mrf.mxu1 }
 0x114   :  { %v394_v63 = vadd.f32 %v393_v61, %v321_v59  ;;  %v431_v0 = vadd.f32 %v430_v62, %v390_v57 }
 0x116   :  { %v437_v2 = vadd.f32 %v431_v0, %v752_v50  ;;  %v435_v6 = vadd.f32 %v434_v60, %v394_v63 }
 0x118   :  { %v443_v7 = vadd.f32 %v504_v1, %v437_v2  ;;  %v438_v8 = vadd.f32 %v435_v6, %v768_v13 }
 0x11a   :  { %445 = vst [vmem:[#allocation7] sm:$0xff] %v443_v7  ;;  %v444_v9 = vadd.f32 %v504_v1, %v438_v8 }
 0x11c   :  { %446 = vst [vmem:[#allocation7 + $0x8] sm:$0xff] %v444_v9 }
 0x11d   :  { %459 = dma.vmem_to_hbm [thread:$0]  %s452_s25, 256, %s454_s28, [#allocation4], %s584_s20, %s584_s20, %s585_s21  }
 0x11e   :  { %581 = dma.done.wait [#allocation4], 256  }
 0x11f   :  { %582 = vsyncadd [#allocation4], 4294967040 }
 0x120   :  { %464 = vsyncpa [#allocation3], 1 }
 0x121   :  { %465 = vsyncpa [#allocation6], 1 }
 0x122   :  { %466 = vsyncpa [#allocation4], 1 }

</bundles_post_ra>
